<compile_context>
chip_gen: v7x
topology: tpu7x:2x2x1
jax: 0.10.0
libtpu: 0.0.40
codegen_flags: <defaults>
</compile_context>

<pallas_src>
import jax
import jax.numpy as jnp
from jax import lax
from jax.experimental import pallas as pl
from jax.experimental.pallas import tpu as pltpu

# Conv2d kwargs chosen for the synthetic block (typical YOLO CNNBlock usage).
KH = KW = 3
PAD = 1
STRIDE = 1          # tap pre-packing below assumes stride 1
LEAKY_SLOPE = 0.1
BN_EPS = 1e-5


def _round_up(x, m):
    return (x + m - 1) // m * m


def _largest_divisor_leq(n, cap):
    for d in range(min(n, cap), 0, -1):
        if n % d == 0:
            return d
    return 1


def _conv_stats_kernel(x_ref, w_ref, y_ref, sum_ref, ssq_ref):
    # x_ref:   (1, K, HW)     bf16  pre-packed conv taps for one sample
    # w_ref:   (Cout8, K)     bf16  conv weights, channels padded to mult. of 8
    # y_ref:   (1, Cout8, HW) f32   channel-major conv output (lane-dense on HW)
    # sum_ref: (1, Cout8, 1)  f32   per-sample channel sums
    # ssq_ref: (1, Cout8, 1)  f32   per-sample channel sum-of-squares
    y_ref[0] = jnp.dot(w_ref[...], x_ref[0], preferred_element_type=jnp.float32)
    y = y_ref[0]                                          # re-load from VMEM (no long-lived vreg acc)
    sum_ref[0] = jnp.sum(y, axis=1, keepdims=True)        # lane-axis (XLU) reductions
    ssq_ref[0] = jnp.sum(y * y, axis=1, keepdims=True)


def _bn_lrelu_kernel(y_ref, scale_ref, bias_ref, o_ref):
    # y_ref: (NB, Cout8, HW) f32; scale/bias: (1, Cout8, 1) f32; o_ref: (NB, Cout8, HW)
    z = y_ref[...] * scale_ref[...] + bias_ref[...]       # folded BN affine
    o_ref[...] = jnp.where(z >= 0, z, LEAKY_SLOPE * z)    # LeakyReLU(0.1)


def cnn_block_forward(x_nchw, w_hwio, gamma, beta):
    N, Cin, H, W = x_nchw.shape
    Cout = w_hwio.shape[-1]
    Hout = (H + 2 * PAD - KH) // STRIDE + 1
    Wout = (W + 2 * PAD - KW) // STRIDE + 1
    HW = Hout * Wout
    K = KH * KW * Cin
    COUT8 = _round_up(Cout, 8)   # channel axis lives on sublanes -> pad to 8, not 128

    # ---- layout glue (XLA): NCHW -> NHWC, halo pad, pack taps, cast bf16 ----
    x_nhwc = jnp.transpose(x_nchw, (0, 2, 3, 1)).astype(jnp.bfloat16)
    x_pad = jnp.pad(x_nhwc, ((0, 0), (PAD, PAD), (PAD, PAD), (0, 0)))
    taps = [x_pad[:, kh:kh + Hout, kw:kw + Wout, :]           # (N, Hout, Wout, Cin)
            for kh in range(KH) for kw in range(KW)]
    patches = jnp.stack(taps, axis=1)                         # (N, KH*KW, Hout, Wout, Cin)
    patches = jnp.transpose(patches, (0, 1, 4, 2, 3))         # (N, KH*KW, Cin, Hout, Wout)
    patches = patches.reshape(N, K, HW)                       # (N, K, HW): K on sublanes, HW on lanes

    # weights: (KH, KW, Cin, Cout) -> (Cout8, K), bf16 (kh,kw,cin order matches patches)
    w_t = jnp.transpose(w_hwio.astype(jnp.float32).reshape(K, Cout), (1, 0))  # (Cout, K)
    w_t = jnp.pad(w_t, ((0, COUT8 - Cout), (0, 0))).astype(jnp.bfloat16)

    # ---- kernel 1: conv as ONE matmul per sample + per-sample BN partial stats ----
    flops1 = 2 * N * COUT8 * K * HW + 3 * N * COUT8 * HW
    bytes1 = 2 * (patches.size + w_t.size) + 4 * (N * COUT8 * HW + 2 * N * COUT8)
    y, s, ss = pl.pallas_call(
        _conv_stats_kernel,
        out_shape=(
            jax.ShapeDtypeStruct((N, COUT8, HW), jnp.float32),
            jax.ShapeDtypeStruct((N, COUT8, 1), jnp.float32),
            jax.ShapeDtypeStruct((N, COUT8, 1), jnp.float32),
        ),
        grid=(N,),
        in_specs=[
            pl.BlockSpec((1, K, HW), lambda n: (n, 0, 0)),
            pl.BlockSpec((COUT8, K), lambda n: (0, 0)),
        ],
        out_specs=(
            pl.BlockSpec((1, COUT8, HW), lambda n: (n, 0, 0)),
            pl.BlockSpec((1, COUT8, 1), lambda n: (n, 0, 0)),   # per-sample partials
            pl.BlockSpec((1, COUT8, 1), lambda n: (n, 0, 0)),   # -> batch axis is parallel-safe
        ),
        compiler_params=pltpu.CompilerParams(
            dimension_semantics=("parallel",)),
        cost_estimate=pl.CostEstimate(
            flops=flops1, transcendentals=0, bytes_accessed=bytes1),
    )(patches, w_t)

    # ---- finish BN batch statistics (training-mode semantics), fold to affine ----
    M = N * HW
    mean = jnp.sum(s[:, :, 0], axis=0) / M                   # (COUT8,)
    e_x2 = jnp.sum(ss[:, :, 0], axis=0) / M
    var = jnp.maximum(e_x2 - mean * mean, 0.0)                # clamp E[x^2]-E[x]^2 cancellation
    gamma_p = jnp.pad(gamma.astype(jnp.float32), (0, COUT8 - Cout))
    beta_p = jnp.pad(beta.astype(jnp.float32), (0, COUT8 - Cout))
    scale = gamma_p * lax.rsqrt(var + BN_EPS)
    bias = beta_p - mean * scale
    # TODO(synk): BatchNorm running_mean/running_var momentum update is training-side
    # state and does not affect the forward output; not modeled here.

    # ---- kernel 2: fused BN affine + LeakyReLU on the channel-major slab ----
    # Process several samples per grid step so each step moves a reasonable block.
    NB = _largest_divisor_leq(N, max(1, (2 << 20) // max(1, COUT8 * HW * 4)))
    flops2 = 4 * N * COUT8 * HW
    bytes2 = 4 * (2 * N * COUT8 * HW + 2 * COUT8)
    out = pl.pallas_call(
        _bn_lrelu_kernel,
        out_shape=jax.ShapeDtypeStruct((N, COUT8, HW), jnp.float32),
        grid=(N // NB,),
        in_specs=[
            pl.BlockSpec((NB, COUT8, HW), lambda i: (i, 0, 0)),
            pl.BlockSpec((1, COUT8, 1), lambda i: (0, 0, 0)),
            pl.BlockSpec((1, COUT8, 1), lambda i: (0, 0, 0)),
        ],
        out_specs=pl.BlockSpec((NB, COUT8, HW), lambda i: (i, 0, 0)),
        compiler_params=pltpu.CompilerParams(
            dimension_semantics=("parallel",)),
        cost_estimate=pl.CostEstimate(
            flops=flops2, transcendentals=0, bytes_accessed=bytes2),
    )(y, scale.reshape(1, COUT8, 1), bias.reshape(1, COUT8, 1))

    # (N, COUT8, HW) -> (N, Cout, H, W): channel un-pad (no-op when Cout%8==0) + free reshape.
    return out[:, :Cout, :].reshape(N, Cout, Hout, Wout)


def reference(x_nchw, w_hwio, gamma, beta):
    # pure-JAX f32 reference mirroring PyTorch CNNBlock.forward (BN in training mode)
    x = jnp.transpose(x_nchw, (0, 2, 3, 1))
    y = lax.conv_general_dilated(
        x, w_hwio, window_strides=(STRIDE, STRIDE),
        padding=((PAD, PAD), (PAD, PAD)),
        dimension_numbers=("NHWC", "HWIO", "NHWC"))
    mean = jnp.mean(y, axis=(0, 1, 2))
    var = jnp.var(y, axis=(0, 1, 2))
    z = gamma * (y - mean) / jnp.sqrt(var + BN_EPS) + beta
    z = jnp.where(z >= 0, z, LEAKY_SLOPE * z)
    return jnp.transpose(z, (0, 3, 1, 2))


if __name__ == "__main__":
    key = jax.random.PRNGKey(0)
    k1, k2, k3, k4 = jax.random.split(key, 4)

    N, Cin, H, W, Cout = 2, 4, 16, 16, 8
    x = jax.random.normal(k1, (N, Cin, H, W), dtype=jnp.float32)
    # deterministic synthetic parameters (shapes from nn.Conv2d / nn.BatchNorm2d)
    w_hwio = 0.1 * jax.random.normal(k2, (KH, KW, Cin, Cout), dtype=jnp.float32)
    gamma = 1.0 + 0.1 * jax.random.normal(k3, (Cout,), dtype=jnp.float32)
    beta = 0.1 * jax.random.normal(k4, (Cout,), dtype=jnp.float32)

    fwd = jax.jit(cnn_block_forward)
    out = jax.block_until_ready(fwd(x, w_hwio, gamma, beta))

    ref = reference(x, w_hwio, gamma, beta)
    assert out.shape == (N, Cout, H, W), out.shape
    # bf16 MXU operands (f32 accumulation): operand rounding ~2^-9 relative; the
    # post-BatchNorm error stays comfortably below this tolerance at these sizes.
    err = float(jnp.max(jnp.abs(out - ref)))
    assert jnp.allclose(out, ref, atol=2e-2, rtol=2e-2), err
    print("KERNEL_OK")
</pallas_src>

<mosaic_0001>
module attributes {stable_mosaic.version = 11 : i64} {
  func.func @_bn_lrelu_kernel(%arg0: i32, %arg1: memref<2x8x256xf32, #tpu.memory_space<vmem>>, %arg2: memref<1x8x1xf32, #tpu.memory_space<vmem>>, %arg3: memref<1x8x1xf32, #tpu.memory_space<vmem>>, %arg4: memref<2x8x256xf32, #tpu.memory_space<vmem>>) attributes {dimension_semantics = [#tpu.dimension_semantics<parallel>], iteration_bounds = array<i64: 1>, scalar_prefetch = 0 : i64, scratch_operands = 0 : i64, tpu.core_type = #tpu.core_type<tc>, window_params = [{transform_indices = @transform_0, window_bounds = array<i64: 2, 8, 256>}, {pipeline_mode = #tpu.pipeline_mode<synchronous>, transform_indices = @transform_1, window_bounds = array<i64: 1, 8, 1>}, {pipeline_mode = #tpu.pipeline_mode<synchronous>, transform_indices = @transform_2, window_bounds = array<i64: 1, 8, 1>}, {transform_indices = @transform_3, window_bounds = array<i64: 2, 8, 256>}]} {
    %c0 = arith.constant 0 : index
    %c0_0 = arith.constant 0 : index
    %c0_1 = arith.constant 0 : index
    %0 = vector.load %arg1[%c0, %c0_0, %c0_1] : memref<2x8x256xf32, #tpu.memory_space<vmem>>, vector<2x8x256xf32>
    %c0_2 = arith.constant 0 : index
    %c0_3 = arith.constant 0 : index
    %c0_4 = arith.constant 0 : index
    %1 = vector.load %arg2[%c0_2, %c0_3, %c0_4] : memref<1x8x1xf32, #tpu.memory_space<vmem>>, vector<1x8x1xf32>
    %2 = vector.broadcast %1 : vector<1x8x1xf32> to vector<2x8x256xf32>
    %3 = arith.mulf %0, %2 : vector<2x8x256xf32>
    %c0_5 = arith.constant 0 : index
    %c0_6 = arith.constant 0 : index
    %c0_7 = arith.constant 0 : index
    %4 = vector.load %arg3[%c0_5, %c0_6, %c0_7] : memref<1x8x1xf32, #tpu.memory_space<vmem>>, vector<1x8x1xf32>
    %5 = vector.broadcast %4 : vector<1x8x1xf32> to vector<2x8x256xf32>
    %6 = arith.addf %3, %5 : vector<2x8x256xf32>
    %cst = arith.constant 0.000000e+00 : f32
    %7 = vector.broadcast %cst : f32 to vector<2x8x256xf32>
    %8 = arith.cmpf oge, %6, %7 : vector<2x8x256xf32>
    %cst_8 = arith.constant 1.000000e-01 : f32
    %9 = vector.broadcast %cst_8 : f32 to vector<2x8x256xf32>
    %10 = arith.mulf %9, %6 : vector<2x8x256xf32>
    %11 = arith.select %8, %6, %10 : vector<2x8x256xi1>, vector<2x8x256xf32>
    %c0_9 = arith.constant 0 : index
    %c0_10 = arith.constant 0 : index
    %c0_11 = arith.constant 0 : index
    %12 = vector.load %arg4[%c0_9, %c0_10, %c0_11] : memref<2x8x256xf32, #tpu.memory_space<vmem>>, vector<2x8x256xf32>
    tpu.vector_store %arg4[%c0_9, %c0_10, %c0_11], %11 {strides = array<i32>} : memref<2x8x256xf32, #tpu.memory_space<vmem>>, vector<2x8x256xf32>,
    return
  }
  func.func @transform_0(%arg0: i32) -> (i32, i32, i32) {
    %c0_i32 = arith.constant 0 : i32
    %c0_i32_0 = arith.constant 0 : i32
    %c0_i32_1 = arith.constant 0 : i32
    return %arg0, %c0_i32, %c0_i32_0 : i32, i32, i32
  }
  func.func @transform_1(%arg0: i32) -> (i32, i32, i32) {
    %c0_i32 = arith.constant 0 : i32
    %c0_i32_0 = arith.constant 0 : i32
    %c0_i32_1 = arith.constant 0 : i32
    %c0_i32_2 = arith.constant 0 : i32
    return %c0_i32, %c0_i32_0, %c0_i32_1 : i32, i32, i32
  }
  func.func @transform_2(%arg0: i32) -> (i32, i32, i32) {
    %c0_i32 = arith.constant 0 : i32
    %c0_i32_0 = arith.constant 0 : i32
    %c0_i32_1 = arith.constant 0 : i32
    %c0_i32_2 = arith.constant 0 : i32
    return %c0_i32, %c0_i32_0, %c0_i32_1 : i32, i32, i32
  }
  func.func @transform_3(%arg0: i32) -> (i32, i32, i32) {
    %c0_i32 = arith.constant 0 : i32
    %c0_i32_0 = arith.constant 0 : i32
    %c0_i32_1 = arith.constant 0 : i32
    return %arg0, %c0_i32, %c0_i32_0 : i32, i32, i32
  }
}

module attributes {stable_mosaic.version = 11 : i64} {
  func.func @_conv_stats_kernel(%arg0: i32, %arg1: memref<1x36x256xbf16, #tpu.memory_space<vmem>>, %arg2: memref<8x36xbf16, #tpu.memory_space<vmem>>, %arg3: memref<1x8x256xf32, #tpu.memory_space<vmem>>, %arg4: memref<1x8x1xf32, #tpu.memory_space<vmem>>, %arg5: memref<1x8x1xf32, #tpu.memory_space<vmem>>) attributes {dimension_semantics = [#tpu.dimension_semantics<parallel>], iteration_bounds = array<i64: 2>, scalar_prefetch = 0 : i64, scratch_operands = 0 : i64, tpu.core_type = #tpu.core_type<tc>, window_params = [{transform_indices = @transform_0, window_bounds = array<i64: 1, 36, 256>}, {pipeline_mode = #tpu.pipeline_mode<synchronous>, transform_indices = @transform_1, window_bounds = array<i64: 8, 36>}, {transform_indices = @transform_2, window_bounds = array<i64: 1, 8, 256>}, {transform_indices = @transform_3, window_bounds = array<i64: 1, 8, 1>}, {transform_indices = @transform_4, window_bounds = array<i64: 1, 8, 1>}]} {
    %c0 = arith.constant 0 : index
    %c0_0 = arith.constant 0 : index
    %0 = vector.load %arg2[%c0, %c0_0] : memref<8x36xbf16, #tpu.memory_space<vmem>>, vector<8x36xbf16>
    %c0_1 = arith.constant 0 : index
    %c0_2 = arith.constant 0 : index
    %c0_3 = arith.constant 0 : index
    %1 = vector.load %arg1[%c0_1, %c0_2, %c0_3] : memref<1x36x256xbf16, #tpu.memory_space<vmem>>, vector<1x36x256xbf16>
    %2 = vector.shape_cast %1 : vector<1x36x256xbf16> to vector<36x256xbf16>
    %cst = arith.constant dense<0.000000e+00> : vector<8x256xf32>
    %3 = tpu.matmul %0, %2, %cst {dimension_numbers = #tpu.dot_dimension_numbers<[1], [0], [0], [1], [0, 0, 1, 1], [], []>} : vector<8x36xbf16>, vector<36x256xbf16>, vector<8x256xf32> -> vector<8x256xf32>
    %c0_4 = arith.constant 0 : index
    %c0_5 = arith.constant 0 : index
    %c0_6 = arith.constant 0 : index
    %4 = vector.load %arg3[%c0_4, %c0_5, %c0_6] : memref<1x8x256xf32, #tpu.memory_space<vmem>>, vector<1x8x256xf32>
    %5 = vector.shape_cast %4 : vector<1x8x256xf32> to vector<8x256xf32>
    %6 = vector.shape_cast %3 : vector<8x256xf32> to vector<1x8x256xf32>
    tpu.vector_store %arg3[%c0_4, %c0_5, %c0_6], %6 {strides = array<i32>} : memref<1x8x256xf32, #tpu.memory_space<vmem>>, vector<1x8x256xf32>,
    %c0_7 = arith.constant 0 : index
    %c0_8 = arith.constant 0 : index
    %c0_9 = arith.constant 0 : index
    %7 = vector.load %arg3[%c0_7, %c0_8, %c0_9] : memref<1x8x256xf32, #tpu.memory_space<vmem>>, vector<1x8x256xf32>
    %8 = vector.shape_cast %7 : vector<1x8x256xf32> to vector<8x256xf32>
    %cst_10 = arith.constant dense<0.000000e+00> : vector<8xf32>
    %9 = vector.multi_reduction <add>, %8, %cst_10 [1] : vector<8x256xf32> to vector<8xf32>
    %10 = vector.shape_cast %9 : vector<8xf32> to vector<8x1xf32>
    %c0_11 = arith.constant 0 : index
    %c0_12 = arith.constant 0 : index
    %c0_13 = arith.constant 0 : index
    %11 = vector.load %arg4[%c0_11, %c0_12, %c0_13] : memref<1x8x1xf32, #tpu.memory_space<vmem>>, vector<1x8x1xf32>
    %12 = vector.shape_cast %11 : vector<1x8x1xf32> to vector<8x1xf32>
    %13 = vector.shape_cast %10 : vector<8x1xf32> to vector<1x8x1xf32>
    tpu.vector_store %arg4[%c0_11, %c0_12, %c0_13], %13 {strides = array<i32>} : memref<1x8x1xf32, #tpu.memory_space<vmem>>, vector<1x8x1xf32>,
    %14 = arith.mulf %8, %8 : vector<8x256xf32>
    %cst_14 = arith.constant dense<0.000000e+00> : vector<8xf32>
    %15 = vector.multi_reduction <add>, %14, %cst_14 [1] : vector<8x256xf32> to vector<8xf32>
    %16 = vector.shape_cast %15 : vector<8xf32> to vector<8x1xf32>
    %c0_15 = arith.constant 0 : index
    %c0_16 = arith.constant 0 : index
    %c0_17 = arith.constant 0 : index
    %17 = vector.load %arg5[%c0_15, %c0_16, %c0_17] : memref<1x8x1xf32, #tpu.memory_space<vmem>>, vector<1x8x1xf32>
    %18 = vector.shape_cast %17 : vector<1x8x1xf32> to vector<8x1xf32>
    %19 = vector.shape_cast %16 : vector<8x1xf32> to vector<1x8x1xf32>
    tpu.vector_store %arg5[%c0_15, %c0_16, %c0_17], %19 {strides = array<i32>} : memref<1x8x1xf32, #tpu.memory_space<vmem>>, vector<1x8x1xf32>,
    return
  }
  func.func @transform_0(%arg0: i32) -> (i32, i32, i32) {
    %c0_i32 = arith.constant 0 : i32
    %c0_i32_0 = arith.constant 0 : i32
    %c0_i32_1 = arith.constant 0 : i32
    return %arg0, %c0_i32, %c0_i32_0 : i32, i32, i32
  }
  func.func @transform_1(%arg0: i32) -> (i32, i32) {
    %c0_i32 = arith.constant 0 : i32
    %c0_i32_0 = arith.constant 0 : i32
    %c0_i32_1 = arith.constant 0 : i32
    return %c0_i32, %c0_i32_0 : i32, i32
  }
  func.func @transform_2(%arg0: i32) -> (i32, i32, i32) {
    %c0_i32 = arith.constant 0 : i32
    %c0_i32_0 = arith.constant 0 : i32
    %c0_i32_1 = arith.constant 0 : i32
    return %arg0, %c0_i32, %c0_i32_0 : i32, i32, i32
  }
  func.func @transform_3(%arg0: i32) -> (i32, i32, i32) {
    %c0_i32 = arith.constant 0 : i32
    %c0_i32_0 = arith.constant 0 : i32
    %c0_i32_1 = arith.constant 0 : i32
    return %arg0, %c0_i32, %c0_i32_0 : i32, i32, i32
  }
  func.func @transform_4(%arg0: i32) -> (i32, i32, i32) {
    %c0_i32 = arith.constant 0 : i32
    %c0_i32_0 = arith.constant 0 : i32
    %c0_i32_1 = arith.constant 0 : i32
    return %arg0, %c0_i32, %c0_i32_0 : i32, i32, i32
  }
}

</mosaic_0001>

<bundles_post_ra>
// kernel: cnn_block_forward.3
= control target key start
LH: loop header
LB: loop body
LE: loop exit
PB: predicated region body
PF: predicated region fallthrough
CT: control target
= control target key end

     0   :  { %v60_v0 = vmov 0   ;;  %s111_s1 = inlined_call_operand.vmem [shape: f32[1,8,1], index: 1, kind: input, shape index: {}]   ;;  %s112_s2 = inlined_call_operand.vmem [shape: f32[1,8,1], index: 2, kind: input, shape index: {}]   ;;  %s113_s0 = inlined_call_operand.vmem [shape: f32[2,8,256], index: 0, kind: input, shape index: {}]   ;;  %s114_s3 = inlined_call_operand.vmem [shape: f32[2,8,256], index: 3, kind: output, shape index: {}]  }
   0x1   :  { %59 = vset.pattern.permute.xlu0 %v60_v0  ;;  %v18_v1 = vld [vmem:[%s111_s1] sm:$0xff]  ;;  %v15_v5 = vld [vmem:[%s113_s0 + $0x8] sm:$0xff]  ;;  %v16_v6 = vld [vmem:[%s113_s0 + $0x10] sm:$0xff] }
   0x2   :  { %21 = vperm.xlu0 %59, %v18_v1   ;;  %v28_v2 = vld [vmem:[%s112_s2] sm:$0xff]  ;;  %v17_v7 = vld [vmem:[%s113_s0 + $0x18] sm:$0xff] }
   0x3   :  { %v14_v3 = vld [vmem:[%s113_s0] sm:$0xff] }
   0x6   :  { %31 = vperm.xlu0 %59, %v28_v2  }
  0x81   :  { %v22_v4 = vpop.permute.xlu0 %21 }
  0x82   :  { %v24_v8 = vmul.f32 %v22_v4, %v14_v3  ;;  %v25_v9 = vmul.f32 %v22_v4, %v15_v5  ;;  %v26_v10 = vmul.f32 %v22_v4, %v16_v6  ;;  %v27_v11 = vmul.f32 %v22_v4, %v17_v7 }
  0x85   :  { %v32_v12 = vpop.permute.xlu0 %31 }
  0x86   :  { %v34_v13 = vadd.f32 %v32_v12, %v24_v8  ;;  %v35_v14 = vadd.f32 %v32_v12, %v25_v9  ;;  %v36_v15 = vadd.f32 %v32_v12, %v26_v10  ;;  %v37_v16 = vadd.f32 %v32_v12, %v27_v11 }
  0x88   :  { %vm38_vm0 = vcmp.ge.f32.partialorder %v34_v13, 0.0  ;;  %vm39_vm1 = vcmp.ge.f32.partialorder %v35_v14, 0.0  ;;  %vm40_vm2 = vcmp.ge.f32.partialorder %v36_v15, 0.0  ;;  %vm41_vm3 = vcmp.ge.f32.partialorder %v37_v16, 0.0 }
  0x89   :  { %v42_v17 = vmul.f32 0.1, %v34_v13  ;;  %v43_v18 = vmul.f32 0.1, %v35_v14  ;;  %v44_v19 = vmul.f32 0.1, %v36_v15 }
  0x8a   :  { %v45_v20 = vmul.f32 0.1, %v37_v16 }
  0x8b   :  { %v46_v21 = vsel %vm38_vm0, %v34_v13, %v42_v17  ;;  %v47_v22 = vsel %vm39_vm1, %v35_v14, %v43_v18  ;;  %v48_v23 = vsel %vm40_vm2, %v36_v15, %v44_v19 }
  0x8c   :  { %v49_v24 = vsel %vm41_vm3, %v37_v16, %v45_v20  ;;  %50 = vst [vmem:[%s114_s3] sm:$0xff] %v46_v21  ;;  %51 = vst [vmem:[%s114_s3 + $0x8] sm:$0xff] %v47_v22 }
  0x8d   :  { %52 = vst [vmem:[%s114_s3 + $0x10] sm:$0xff] %v48_v23  ;;  %53 = vst [vmem:[%s114_s3 + $0x18] sm:$0xff] %v49_v24 }

// kernel: cnn_block_forward.2
= control target key start
LH: loop header
LB: loop body
LE: loop exit
PB: predicated region body
PF: predicated region fallthrough
CT: control target
= control target key end

     0   :  { %s508_s15 = smov 0   ;;  %s539_s0 = inlined_call_operand.vmem [shape: bf16[2,36,256], index: 0, kind: input, shape index: {}]   ;;  %s540_s1 = inlined_call_operand.vmem [shape: bf16[8,36], index: 1, kind: input, shape index: {}]   ;;  %s541_s2 = inlined_call_operand.vmem [shape: f32[2,8,256], index: 2, kind: output, shape index: {0}]   ;;  %s542_s3 = inlined_call_operand.vmem [shape: f32[2,8,1], index: 3, kind: output, shape index: {1}]   ;;  %s543_s4 = inlined_call_operand.vmem [shape: f32[2,8,1], index: 4, kind: output, shape index: {2}]  }
   0x1 LB: > { %s435_s16 = sadd.s32 4294967295, %s480_s15   ;;  %p439_p0 = scmp.ge.s32.totalorder %s480_s15, 1  ;;  %s480_s15 = sphi %s508_s15, %s15_s15  }
   0x2   : > { %p167_p1 = scmp.lt.s32.totalorder %s480_s15, 3 }
   0x4   : > { %p168_p2 = pnand %p439_p0, %p167_p1 }
   0x5   : > { %p201_p3 = scmp.lt.s32.totalorder (!%p168_p2), %s435_s16, 1  ;;  %v482_v0 = vmov (!%p168_p2), 0   ;;  %vm255_vm0 = vcmask (!%p168_p2), 1041408   ;;  %v220_v9 = vld [vmem:[%s540_s1] sm:$0xf] (!%p168_p2)  ;;  %vm251_vm1 = vcmask (!%p168_p2), 293888  }
   0x6   : > { %171 = sbr.rel (%p168_p2) target bundleno = 392 (0x188), region = 28  ;;  %294 = vmatprep.mubr.bf16.mxu0 (!%p168_p2), %v482_v0  ;;  %vm310_vm2 = vcmask (!%p168_p2), 7168  }
   0xd   : > { %s545_s16 = smov (!%p201_p3, %s435_s16), 1 }
   0xe   : > { %s456_s17 = smul.u32 40, %s545_s16  ;;  %s455_s23 = sshll.u32 %s545_s16, 4 }
   0xf   : > { %s210_s26 = scalar_lea.vmem %s541_s2, %s455_s23  ;;  %s443_s27 = sshll.u32 %s545_s16, 3 }
  0x10   : > { %s205_s20 = scalar_lea.vmem %s539_s0, %s456_s17  ;;  %s214_s30 = scalar_lea.vmem %s542_s3, %s443_s27 }
  0x11   : > { %v466_v1 = vld [vmem:[%s205_s20 + $0x4] ss:$8 sps:$4 sm:$0xff]   ;;  %v468_v2 = vld [vmem:[%s205_s20] ss:$8 sps:$4 sm:$0xff]   ;;  %v469_v3 = vld [vmem:[%s205_s20 + $0x14] ss:$8 sps:$4 sm:$0xff]   ;;  %s218_s7 = scalar_lea.vmem %s543_s4, %s443_s27 }
  0x12   : > { %262 = vmatprep.subr.bf16.mxu0 %v466_v1  ;;  %v225_v4 = vld [vmem:[%s205_s20 + $0x20] sm:$0x33]  ;;  %v471_v5 = vld [vmem:[%s205_s20 + $0x10] ss:$8 sps:$4 sm:$0xff]  }
  0x13   : > { %263 = vmatpush1.bf16.msra.mxu0 %v468_v2  ;;  %v450_v6 = vcombine.high %v225_v4, %v225_v4  ;;  %v449_v7 = vcombine.low %v225_v4, %v225_v4 }
  0x14   : > { %264 = vmatprep.subr.bf16.mxu0 %v469_v3 }
  0x15   : > { %v257_v8 = vsel %vm255_vm0, %v449_v7, 0 }
  0x17   : > { %265 = vmatpush1.bf16.msra.mxu0 %v471_v5 }
  0x18   : > { %451 = vmatprep.subr.msk.bf16.mxu0 %vm255_vm0, %v450_v6 }
  0x1b   : > { %267 = vmatpush1.bf16.msra.mxu0 %v257_v8 }
  0x1e   : > { %452 = vmatmul.mubr.msk.bf16.vlgmr.msra.gmra.mrb[0].mxu0 %vm251_vm1, %v220_v9 }
  0xf1   : > { %v296_v10 = vpop.f32.mrb[0].mxu0 }
  0xf2   : > { %303 = vst [vmem:[%s210_s26] sm:$0xff] %v296_v10  ;;  %v298_v11 = vpop.f32.mrb[1].mxu0  ;;  %v312_v12 = vmul.f32 %v296_v10, %v296_v10 }
  0xf3   : > { %304 = vst [vmem:[%s210_s26 + $0x8] sm:$0xff] %v298_v11  ;;  %v300_v13 = vpop.f32.mrb[2].mxu0  ;;  %v307_v14 = vadd.f32 %v298_v11, %v296_v10  ;;  %v313_v15 = vmul.f32 %v298_v11, %v298_v11 }
  0xf4   : > { %v301_v16 = vpop.f32.mrb[3].mxu0 }
  0xf5   : > { %308 = vadd.xlane.f32.xlu0 %v307_v14  ;;  %v314_v17 = vadd.f32 %v313_v15, %v312_v12 }
  0xf9   : > { %315 = vadd.xlane.f32.xlu0 %v314_v17 }
 0x182   : > { %v309_v18 = vpop.xlane.xlu0 %308 }
 0x183   : > { %311 = vst.msk [vmem:[%s214_s30] sm:$0xff] %vm310_vm2, %v309_v18 }
 0x186   : > { %v316_v19 = vpop.xlane.xlu0 %315 }
 0x187   : > { %317 = vst.msk [vmem:[%s218_s7] sm:$0xff] %vm310_vm2, %v316_v19 }
 0x188 PF: > { %s15_s15 = sadd.s32 1, %s480_s15  }
 0x189   : > { %p12_p4 = scmp.ge.s32.totalorder %s15_s15, 4  }
 0x18b   :  { %14 = sbr.rel (!%p12_p4) target bundleno = 1 (0x1), region = 82 }

</bundles_post_ra>
